<compile_context>
chip_gen: v5e
topology: v5e:2x2
jax: 0.10.0
libtpu: 0.0.40
codegen_flags: <defaults>
</compile_context>

<pallas_src>
import jax
import jax.numpy as jnp
from jax.experimental import pallas as pl
from jax.experimental.pallas import tpu as pltpu


def _copy_kernel(x_ref, o_ref):
    # Identity permutation over the batch -> single whole-tile unmasked copy
    # (store-slot-optimal form, esp. on v5e's single vst slot).
    o_ref[...] = x_ref[...]


def _make_static_permute_kernel(indices):
    # General static permutation: unrolled static-offset row copies.
    # Each (1, flat) row is lane-dense; the LLO scheduler overlaps the
    # vld/vst pairs freely and no XLU shuffle is generated.
    idx = tuple(int(i) for i in indices)

    def _permute_kernel(x_ref, o_ref):
        for d, s in enumerate(idx):
            o_ref[d, :] = x_ref[s, :]

    return _permute_kernel


def batch_select_concat(x, indices, *, force_kernel=False):
    """Equivalent of: torch.cat([torch.split(x, 1, 0)[i] for i in indices], 0)."""
    N, C, H, W = x.shape
    indices = [int(i) for i in indices]
    n_out = len(indices)
    assert all(0 <= i < N for i in indices), "static index out of range"

    identity = (n_out == N) and (indices == list(range(N)))

    # Highest-value optimization: the identity gather is a no-op — elide the
    # kernel (and all HBM traffic / launch overhead) entirely.
    if identity and not force_kernel:
        return x

    # Lane-dense 2-D view: batch on sublanes, features on lanes.
    # Whole-array blocks are exempt from the (8,128) divisibility rule, so no
    # wrapper-side padding pass is needed.
    flat = C * H * W
    x2d = x.reshape(N, flat)

    kernel = _copy_kernel if identity else _make_static_permute_kernel(indices)
    itemsize = jnp.dtype(x.dtype).itemsize
    cost = pl.CostEstimate(
        flops=0,
        transcendentals=0,
        bytes_accessed=(N + n_out) * flat * itemsize,
    )

    call_kwargs = dict(
        out_shape=jax.ShapeDtypeStruct((n_out, flat), x.dtype),
        # Single gridless invocation; whole arrays resident in VMEM (~30 KB).
        in_specs=[pl.BlockSpec(memory_space=pltpu.MemorySpace.VMEM)],
        out_specs=pl.BlockSpec(memory_space=pltpu.MemorySpace.VMEM),
        cost_estimate=cost,
    )
    if identity:
        # Identity forced through the kernel: reuse the input HBM buffer.
        call_kwargs["input_output_aliases"] = {0: 0}

    out2d = pl.pallas_call(kernel, **call_kwargs)(x2d)
    return out2d.reshape(n_out, C, H, W)


def init_unused_conv_params(key):
    # Conv2d(3, 8, kernel_size=1, stride=1, padding=1) — unused in forward().
    kw, kb = jax.random.split(key)
    fan_in = 3 * 1 * 1
    bound = 1.0 / (fan_in ** 0.5)
    w = jax.random.uniform(kw, (8, 3, 1, 1), jnp.float32, -bound, bound)
    b = jax.random.uniform(kb, (8,), jnp.float32, -bound, bound)
    return w, b


def model_forward(x):
    # indices = list(range(0, 10)); the "if i in range(0, 10)" filter keeps all,
    # so the forward pass is the identity batch gather.
    indices = [i for i in range(0, 10) if i in range(0, 10)]
    return batch_select_concat(x, indices)


if __name__ == "__main__":
    key = jax.random.PRNGKey(0)
    k_x, k_p = jax.random.split(key)

    # Batch must be 10 (the module hard-codes indices 0..9); small spatial.
    x = jax.random.normal(k_x, (10, 3, 16, 16), dtype=jnp.float32)

    # Deterministic (unused) conv parameters matching the module's __init__.
    conv_w, conv_b = init_unused_conv_params(k_p)

    # 1) Module forward: identity gather -> trace-time short circuit (no kernel).
    out = jax.block_until_ready(model_forward(x))
    assert out.shape == x.shape, (out.shape, x.shape)
    assert bool(jnp.allclose(out, x)), "identity forward mismatch"

    # 2) Exercise the Pallas kernels once on TPU:
    #    a) identity path forced through the (aliased) whole-tile copy kernel
    out_id = jax.block_until_ready(
        batch_select_concat(x, list(range(10)), force_kernel=True))
    assert out_id.shape == x.shape
    assert bool(jnp.allclose(out_id, x)), "identity kernel mismatch"

    #    b) general static-permutation path (unrolled static row copies)
    perm = [9, 3, 3, 0, 7, 1, 5, 2, 8, 4]
    out_p = jax.block_until_ready(batch_select_concat(x, perm))
    ref_p = x[jnp.asarray(perm, dtype=jnp.int32)]
    assert out_p.shape == ref_p.shape
    assert bool(jnp.allclose(out_p, ref_p)), "permutation kernel mismatch"

    print("KERNEL_OK")
</pallas_src>

<mosaic_0001>
module attributes {stable_mosaic.version = 11 : i64} {
  func.func @_copy_kernel(%arg0: memref<10x768xf32, #tpu.memory_space<vmem>>, %arg1: memref<10x768xf32, #tpu.memory_space<vmem>>) attributes {dimension_semantics = [], scalar_prefetch = 0 : i64, scratch_operands = 0 : i64, tpu.core_type = #tpu.core_type<tc>} {
    %c0 = arith.constant 0 : index
    %c0_0 = arith.constant 0 : index
    %0 = vector.load %arg0[%c0, %c0_0] : memref<10x768xf32, #tpu.memory_space<vmem>>, vector<10x768xf32>
    %c0_1 = arith.constant 0 : index
    %c0_2 = arith.constant 0 : index
    %1 = vector.load %arg1[%c0_1, %c0_2] : memref<10x768xf32, #tpu.memory_space<vmem>>, vector<10x768xf32>
    tpu.vector_store %arg1[%c0_1, %c0_2], %0 {strides = array<i32>} : memref<10x768xf32, #tpu.memory_space<vmem>>, vector<10x768xf32>,
    return
  }
}

</mosaic_0001>

<bundles_post_ra>
// kernel: tpu_custom_call.1
= control target key start
LH: loop header
LB: loop body
LE: loop exit
PB: predicated region body
PF: predicated region fallthrough
CT: control target
= control target key end

     0   :  { %6 = vsyncpa [#allocation3], 0  ;;  %s150_s0 = inlined_call_operand.hbm [shape: f32[10,768], index: 0, kind: input, shape index: {}, may-alias: {0,1}]   ;;  %s151_s1 = inlined_call_operand.hbm [shape: f32[10,768], index: 1, kind: output, shape index: {}, may-alias: {0,1}]  }
   0x1   :  { %7 = vsyncpa [#allocation4], 0  ;;  %s12_s8 = sshll.u32 %s150_s0, 4  ;;  %s124_s9 = smov [#allocation2]   ;;  %s13_s8 = int_to_ptr.hbm [resolvable:$true] %s12_s8 }
   0x2   :  { %s14_s10 = sshll.u32 %s124_s9, 4  ;;  %s125_s11 = smov 768   ;;  %s15_s10 = int_to_ptr.vmem [resolvable:$true] %s14_s10 }
   0x3   :  { %s126_s12 = smov 48  }
   0x4   :  { %20 = dma.hbm_to_vmem [thread:$0]  %s13_s8, 1536, %s15_s10, [#allocation3], %s125_s11, %s125_s11, %s126_s12  }
   0x5   :  { %120 = dma.done.wait [#allocation3], 1536  }
   0x6   :  { %121 = vsyncadd [#allocation3], 4294965760  ;;  %v25_v0 = vld [vmem:[#allocation2] sm:$0xff]  ;;  %v26_v1 = vld [vmem:[#allocation2 + $0x8] sm:$0xff]  ;;  %s127_s0 = smov [#allocation5]   ;;  %s55_s16 = sshll.u32 %s151_s1, 4  ;;  %s56_s16 = int_to_ptr.hbm [resolvable:$true] %s55_s16 }
   0x7   :  { %v27_v2 = vld [vmem:[#allocation2 + $0x10] sm:$0xff]  ;;  %37 = vst [vmem:[#allocation5] sm:$0xff] %v25_v0  ;;  %v28_v3 = vld [vmem:[#allocation2 + $0x18] sm:$0xff]  ;;  %v29_v4 = vld [vmem:[#allocation2 + $0x20] sm:$0xff]  ;;  %s53_s13 = sshll.u32 %s127_s0, 4  ;;  %s54_s13 = int_to_ptr.vmem [resolvable:$true] %s53_s13 }
   0x8   :  { %38 = vst [vmem:[#allocation5 + $0x8] sm:$0xff] %v26_v1  ;;  %v30_v5 = vld [vmem:[#allocation2 + $0x28] sm:$0xff]  ;;  %v31_v6 = vld [vmem:[#allocation2 + $0x30] sm:$0x3]  ;;  %v32_v7 = vld [vmem:[#allocation2 + $0x38] sm:$0x3] }
   0x9   :  { %39 = vst [vmem:[#allocation5 + $0x10] sm:$0xff] %v27_v2  ;;  %v33_v8 = vld [vmem:[#allocation2 + $0x40] sm:$0x3]  ;;  %v34_v9 = vld [vmem:[#allocation2 + $0x48] sm:$0x3] }
   0xa   :  { %40 = vst [vmem:[#allocation5 + $0x18] sm:$0xff] %v28_v3  ;;  %v35_v10 = vld [vmem:[#allocation2 + $0x50] sm:$0x3]  ;;  %v36_v11 = vld [vmem:[#allocation2 + $0x58] sm:$0x3] }
   0xb   :  { %41 = vst [vmem:[#allocation5 + $0x20] sm:$0xff] %v29_v4 }
   0xc   :  { %42 = vst [vmem:[#allocation5 + $0x28] sm:$0xff] %v30_v5 }
   0xd   :  { %43 = vst [vmem:[#allocation5 + $0x30] sm:$0x3] %v31_v6 }
   0xe   :  { %44 = vst [vmem:[#allocation5 + $0x38] sm:$0x3] %v32_v7 }
   0xf   :  { %45 = vst [vmem:[#allocation5 + $0x40] sm:$0x3] %v33_v8 }
  0x10   :  { %46 = vst [vmem:[#allocation5 + $0x48] sm:$0x3] %v34_v9 }
  0x11   :  { %47 = vst [vmem:[#allocation5 + $0x50] sm:$0x3] %v35_v10 }
  0x12   :  { %48 = vst [vmem:[#allocation5 + $0x58] sm:$0x3] %v36_v11 }
  0x13   :  { %61 = dma.vmem_to_hbm [thread:$0]  %s54_s13, 1536, %s56_s16, [#allocation4], %s125_s11, %s125_s11, %s126_s12  }
  0x14   :  { %122 = dma.done.wait [#allocation4], 1536  }
  0x15   :  { %123 = vsyncadd [#allocation4], 4294965760 }
  0x16   :  { %66 = vsyncpa [#allocation3], 1 }
  0x17   :  { %67 = vsyncpa [#allocation4], 1 }

</bundles_post_ra>
